<compile_context>
chip_gen: v7x
topology: tpu7x:2x2x1
jax: 0.10.0
libtpu: 0.0.40
codegen_flags: <defaults>
</compile_context>

<pallas_src>
import functools
import math

import jax
import jax.numpy as jnp
from jax.experimental import pallas as pl
from jax.experimental.pallas import tpu as pltpu


def _infinite_width_kernel(t_ref, w0_ref, b0_ref, w1_ref, b1_ref, o_ref):
    """One batch tile.

    t_ref  : (1, TILE_B)  time points (lane-dense)
    w0_ref : (H, 1)       fc0 weight column, already spectral-normalized
    b0_ref : (H, 1)       fc0 bias column
    w1_ref : (H, 1)       fc1 weight column
    b1_ref : SMEM (1,)    fc1 bias
    o_ref  : (1, TILE_B)  output (lane-dense)
    """
    t = t_ref[...]                                         # (1, TILE_B)
    # hidden = relu(W0 t + b0): broadcast outer-product on the VPU (no MXU).
    h = jnp.maximum(w0_ref[...] * t + b0_ref[...], 0.0)    # (H, TILE_B)
    # out = W1 hidden + b1: elementwise mul + cross-sublane reduce (XLU).
    out = jnp.sum(h * w1_ref[...], axis=0, keepdims=True) + b1_ref[0]
    o_ref[...] = out.astype(o_ref.dtype)


def _choose_tile_b(batch, *, max_tile=4096, min_steps=4):
    """Pick a lane tile: big enough to amortize per-step overhead, but keep
    >= min_steps grid steps (when the batch allows) so both v7x TCs get work."""
    b128 = ((batch + 127) // 128) * 128
    tile = max(128, (b128 // min_steps) // 128 * 128)
    return int(min(max_tile, tile))


@functools.partial(jax.jit, static_argnames=("tile_b",))
def infinite_width_net(t, w0, b0, w1, b1, *, tile_b=None):
    """Forward pass of InfiniteWidthNet.

    t  : (B, 1) or (B,)  input times
    w0 : (H, 1)  fc0.weight_orig  (spectral norm applied here, exactly)
    b0 : (H,)    fc0.bias
    w1 : (1, H)  fc1.weight
    b1 : (1,)    fc1.bias
    returns (B, 1) float32
    """
    t = jnp.asarray(t, jnp.float32).reshape(-1)
    B = t.shape[0]
    H = w0.shape[0]

    if tile_b is None:
        tile_b = _choose_tile_b(B)
    n_tiles = pl.cdiv(B, tile_b)
    b_pad = n_tiles * tile_b

    # Lane-dense batch row; pad only if needed (fuses under jit).  Pad value 0
    # is required: padded lanes compute relu(b0)*w1 garbage that the final
    # slice discards (no reduction over the batch axis, so this is safe).
    t_row = t.reshape(1, B)
    if b_pad != B:
        t_row = jnp.pad(t_row, ((0, 0), (0, b_pad - B)))

    # Weights / biases in their natural column layout (no transposes needed).
    w0_col = w0.reshape(H, 1).astype(jnp.float32)
    b0_col = b0.reshape(H, 1).astype(jnp.float32)
    w1_col = w1.reshape(H, 1).astype(jnp.float32)    # fc1.weight (1, H) -> (H, 1)

    # Spectral norm of the rank-1 (H, 1) weight == its Frobenius norm.  Fold
    # 1/sigma into w0 here so the kernel never rescales it per grid step.
    sigma = jnp.sqrt(jnp.sum(w0_col * w0_col))
    w0_col = w0_col / jnp.maximum(sigma, 1e-12)

    b1_smem = jnp.asarray(b1, jnp.float32).reshape(1)

    # TODO(synk): if `how_big` is scaled to many thousands, pack the three
    # (H,1) columns into one resident array (or grid H with an accumulator)
    # and consider a bf16 hidden on v6e/v7x; unnecessary at module-scale H.
    out_row = pl.pallas_call(
        _infinite_width_kernel,
        out_shape=jax.ShapeDtypeStruct((1, b_pad), jnp.float32),
        grid=(n_tiles,),
        in_specs=[
            pl.BlockSpec((1, tile_b), lambda i: (0, i)),          # t tile
            pl.BlockSpec((H, 1), lambda i: (0, 0)),               # w0 (VMEM-resident)
            pl.BlockSpec((H, 1), lambda i: (0, 0)),               # b0 (VMEM-resident)
            pl.BlockSpec((H, 1), lambda i: (0, 0)),               # w1 (VMEM-resident)
            pl.BlockSpec(memory_space=pltpu.MemorySpace.SMEM),    # b1 scalar
        ],
        out_specs=pl.BlockSpec((1, tile_b), lambda i: (0, i)),
        compiler_params=pltpu.CompilerParams(
            dimension_semantics=("parallel",),                    # split B over TCs (v7x)
        ),
    )(t_row, w0_col, b0_col, w1_col, b1_smem)

    return out_row[0, :B].reshape(B, 1)


def _reference(t, w0, b0, w1, b1):
    sigma = jnp.sqrt(jnp.sum(w0.astype(jnp.float32) ** 2))
    h = jnp.maximum(t @ (w0 / sigma).T + b0, 0.0)
    return h @ w1.T + b1


if __name__ == "__main__":
    H = 100        # how_big (module default)

    key = jax.random.PRNGKey(0)
    k_t, k_w0, k_b0, k_w1, k_b1, k_t2 = jax.random.split(key, 6)

    # Deterministic "PyTorch-style" uniform init (bounds from nn.Linear).
    bound0 = 1.0 / math.sqrt(1.0)   # fan_in of fc0 = 1
    bound1 = 1.0 / math.sqrt(H)     # fan_in of fc1 = H

    w0 = jax.random.uniform(k_w0, (H, 1), jnp.float32, -bound0, bound0)
    b0 = jax.random.uniform(k_b0, (H,), jnp.float32, -bound0, bound0)
    w1 = jax.random.uniform(k_w1, (1, H), jnp.float32, -bound1, bound1)
    b1 = jax.random.uniform(k_b1, (1,), jnp.float32, -bound1, bound1)

    # Case 1: tiny ragged batch (single tile, exercises padding path).
    B1 = 10
    t1 = jax.random.normal(k_t, (B1, 1), dtype=jnp.float32)
    out1 = jax.block_until_ready(infinite_width_net(t1, w0, b0, w1, b1))
    ref1 = _reference(t1, w0, b0, w1, b1)
    assert out1.shape == (B1, 1)
    assert jnp.allclose(out1, ref1, atol=1e-5, rtol=1e-5), "mismatch vs reference (B=10)"

    # Case 2: multi-tile batch (grid > 1, ragged tail in the last tile).
    B2 = 300
    t2 = jax.random.normal(k_t2, (B2, 1), dtype=jnp.float32)
    out2 = jax.block_until_ready(infinite_width_net(t2, w0, b0, w1, b1))
    ref2 = _reference(t2, w0, b0, w1, b1)
    assert out2.shape == (B2, 1)
    assert jnp.allclose(out2, ref2, atol=1e-5, rtol=1e-5), "mismatch vs reference (B=300)"

    print("KERNEL_OK")
</pallas_src>

<mosaic_0001>
module attributes {stable_mosaic.version = 11 : i64} {
  func.func @_infinite_width_kernel(%arg0: i32, %arg1: memref<1x128xf32, #tpu.memory_space<vmem>>, %arg2: memref<100x1xf32, #tpu.memory_space<vmem>>, %arg3: memref<100x1xf32, #tpu.memory_space<vmem>>, %arg4: memref<100x1xf32, #tpu.memory_space<vmem>>, %arg5: memref<1xf32, #tpu.memory_space<smem>>, %arg6: memref<1x128xf32, #tpu.memory_space<vmem>>) attributes {dimension_semantics = [#tpu.dimension_semantics<parallel>], iteration_bounds = array<i64: 1>, scalar_prefetch = 0 : i64, scratch_operands = 0 : i64, tpu.core_type = #tpu.core_type<tc>, window_params = [{transform_indices = @transform_0, window_bounds = array<i64: 1, 128>}, {pipeline_mode = #tpu.pipeline_mode<synchronous>, transform_indices = @transform_1, window_bounds = array<i64: 100, 1>}, {pipeline_mode = #tpu.pipeline_mode<synchronous>, transform_indices = @transform_2, window_bounds = array<i64: 100, 1>}, {pipeline_mode = #tpu.pipeline_mode<synchronous>, transform_indices = @transform_3, window_bounds = array<i64: 100, 1>}, {transform_indices = @transform_4, window_bounds = array<i64: 1>}, {transform_indices = @transform_5, window_bounds = array<i64: 1, 128>}]} {
    %c0 = arith.constant 0 : index
    %c0_0 = arith.constant 0 : index
    %0 = vector.load %arg1[%c0, %c0_0] : memref<1x128xf32, #tpu.memory_space<vmem>>, vector<1x128xf32>
    %c0_1 = arith.constant 0 : index
    %c0_2 = arith.constant 0 : index
    %1 = vector.load %arg2[%c0_1, %c0_2] : memref<100x1xf32, #tpu.memory_space<vmem>>, vector<100x1xf32>
    %2 = vector.broadcast %1 : vector<100x1xf32> to vector<100x128xf32>
    %3 = vector.broadcast %0 : vector<1x128xf32> to vector<100x128xf32>
    %4 = arith.mulf %2, %3 : vector<100x128xf32>
    %c0_3 = arith.constant 0 : index
    %c0_4 = arith.constant 0 : index
    %5 = vector.load %arg3[%c0_3, %c0_4] : memref<100x1xf32, #tpu.memory_space<vmem>>, vector<100x1xf32>
    %6 = vector.broadcast %5 : vector<100x1xf32> to vector<100x128xf32>
    %7 = arith.addf %4, %6 : vector<100x128xf32>
    %cst = arith.constant 0.000000e+00 : f32
    %8 = vector.broadcast %cst : f32 to vector<100x128xf32>
    %9 = arith.maximumf %7, %8 : vector<100x128xf32>
    %c0_5 = arith.constant 0 : index
    %c0_6 = arith.constant 0 : index
    %10 = vector.load %arg4[%c0_5, %c0_6] : memref<100x1xf32, #tpu.memory_space<vmem>>, vector<100x1xf32>
    %11 = vector.broadcast %10 : vector<100x1xf32> to vector<100x128xf32>
    %12 = arith.mulf %9, %11 : vector<100x128xf32>
    %cst_7 = arith.constant dense<0.000000e+00> : vector<128xf32>
    %13 = vector.multi_reduction <add>, %12, %cst_7 [0] : vector<100x128xf32> to vector<128xf32>
    %14 = vector.shape_cast %13 : vector<128xf32> to vector<1x128xf32>
    %c0_8 = arith.constant 0 : index
    %15 = memref.load %arg5[%c0_8] : memref<1xf32, #tpu.memory_space<smem>>
    %16 = vector.broadcast %15 : f32 to vector<1x128xf32>
    %17 = arith.addf %14, %16 : vector<1x128xf32>
    %c0_9 = arith.constant 0 : index
    %c0_10 = arith.constant 0 : index
    %18 = vector.load %arg6[%c0_9, %c0_10] : memref<1x128xf32, #tpu.memory_space<vmem>>, vector<1x128xf32>
    tpu.vector_store %arg6[%c0_9, %c0_10], %17 {strides = array<i32>} : memref<1x128xf32, #tpu.memory_space<vmem>>, vector<1x128xf32>,
    return
  }
  func.func @transform_0(%arg0: i32) -> (i32, i32) {
    %c0_i32 = arith.constant 0 : i32
    %c0_i32_0 = arith.constant 0 : i32
    return %c0_i32, %arg0 : i32, i32
  }
  func.func @transform_1(%arg0: i32) -> (i32, i32) {
    %c0_i32 = arith.constant 0 : i32
    %c0_i32_0 = arith.constant 0 : i32
    %c0_i32_1 = arith.constant 0 : i32
    return %c0_i32, %c0_i32_0 : i32, i32
  }
  func.func @transform_2(%arg0: i32) -> (i32, i32) {
    %c0_i32 = arith.constant 0 : i32
    %c0_i32_0 = arith.constant 0 : i32
    %c0_i32_1 = arith.constant 0 : i32
    return %c0_i32, %c0_i32_0 : i32, i32
  }
  func.func @transform_3(%arg0: i32) -> (i32, i32) {
    %c0_i32 = arith.constant 0 : i32
    %c0_i32_0 = arith.constant 0 : i32
    %c0_i32_1 = arith.constant 0 : i32
    return %c0_i32, %c0_i32_0 : i32, i32
  }
  func.func @transform_4(%arg0: i32) -> i32 {
    %c0_i32 = arith.constant 0 : i32
    %c0_i32_0 = arith.constant 0 : i32
    return %c0_i32 : i32
  }
  func.func @transform_5(%arg0: i32) -> (i32, i32) {
    %c0_i32 = arith.constant 0 : i32
    %c0_i32_0 = arith.constant 0 : i32
    return %c0_i32, %arg0 : i32, i32
  }
}

</mosaic_0001>

<bundles_post_ra>
// kernel: infinite_width_net.1
= control target key start
LH: loop header
LB: loop body
LE: loop exit
PB: predicated region body
PF: predicated region fallthrough
CT: control target
= control target key end

     0   :  { %v346_v0 = vmov 0   ;;  %vm325_vm0 = vcmask 1043456   ;;  %s524_s1 = inlined_call_operand.vmem [shape: f32[100,1], index: 1, kind: input, shape index: {}]   ;;  %s525_s2 = inlined_call_operand.vmem [shape: f32[100,1], index: 2, kind: input, shape index: {}]   ;;  %s526_s3 = inlined_call_operand.vmem [shape: f32[100,1], index: 3, kind: input, shape index: {}]   ;;  %s527_s0 = inlined_call_operand.vmem [shape: f32[1,128], index: 0, kind: input, shape index: {}]   ;;  %s528_s4 = inlined_call_operand.<no memory space> [shape: f32[1], index: 4, kind: input, shape index: {}]   ;;  %s529_s5 = inlined_call_operand.vmem [shape: f32[1,128], index: 5, kind: output, shape index: {}]  }
   0x1   :  { %345 = vset.pattern.permute.xlu1 %v346_v0  ;;  %344 = vset.pattern.permute.xlu0 %v346_v0  ;;  %v24_v1 = vld [vmem:[%s524_s1 + $0x10] sm:$0xff]  ;;  %v22_v2 = vld [vmem:[%s524_s1] sm:$0xff]  ;;  %v25_v3 = vld [vmem:[%s524_s1 + $0x18] sm:$0xff] }
   0x2   :  { %47 = vperm.xlu1 %345, %v24_v1   ;;  %37 = vperm.xlu0 %344, %v22_v2   ;;  %v23_v4 = vld [vmem:[%s524_s1 + $0x8] sm:$0xff]  ;;  %v26_v6 = vld [vmem:[%s524_s1 + $0x20] sm:$0xff]  ;;  %v29_v7 = vld [vmem:[%s524_s1 + $0x38] sm:$0xff] }
   0x3   :  { %v27_v5 = vld [vmem:[%s524_s1 + $0x28] sm:$0xff]  ;;  %v28_v8 = vld [vmem:[%s524_s1 + $0x30] sm:$0xff]  ;;  %v30_v10 = vld [vmem:[%s524_s1 + $0x40] sm:$0xff] }
   0x4   :  { %v31_v9 = vld [vmem:[%s524_s1 + $0x48] sm:$0xff]  ;;  %v33_v11 = vld [vmem:[%s524_s1 + $0x58] sm:$0xff]  ;;  %v32_v12 = vld [vmem:[%s524_s1 + $0x50] sm:$0xff] }
   0x5   :  { %v120_v13 = vld [vmem:[%s525_s2 + $0x8] sm:$0xff]  ;;  %v119_v14 = vld [vmem:[%s525_s2] sm:$0xff]  ;;  %v122_v15 = vld [vmem:[%s525_s2 + $0x18] sm:$0xff] }
   0x6   :  { %52 = vperm.xlu1 %345, %v25_v3   ;;  %42 = vperm.xlu0 %344, %v23_v4   ;;  %v121_v16 = vld [vmem:[%s525_s2 + $0x10] sm:$0xff]  ;;  %v224_v17 = vld [vmem:[%s526_s3 + $0x8] sm:$0xff]  ;;  %v223_v18 = vld [vmem:[%s526_s3] sm:$0xff] }
   0x7   :  { %v225_v19 = vld [vmem:[%s526_s3 + $0x10] sm:$0xff]  ;;  %v123_v20 = vld [vmem:[%s525_s2 + $0x20] sm:$0xff]  ;;  %v226_v21 = vld [vmem:[%s526_s3 + $0x18] sm:$0xff] }
   0x8   :  { %v124_v22 = vld [vmem:[%s525_s2 + $0x28] sm:$0xff]  ;;  %v227_v23 = vld [vmem:[%s526_s3 + $0x20] sm:$0xff]  ;;  %v125_v24 = vld [vmem:[%s525_s2 + $0x30] sm:$0xff] }
   0x9   :  { %v228_v25 = vld [vmem:[%s526_s3 + $0x28] sm:$0xff]  ;;  %v126_v26 = vld [vmem:[%s525_s2 + $0x38] sm:$0xff]  ;;  %v229_v27 = vld [vmem:[%s526_s3 + $0x30] sm:$0xff] }
   0xa   :  { %62 = vperm.xlu1 %345, %v27_v5   ;;  %57 = vperm.xlu0 %344, %v26_v6   ;;  %v127_v28 = vld [vmem:[%s525_s2 + $0x40] sm:$0xff]  ;;  %v230_v29 = vld [vmem:[%s526_s3 + $0x38] sm:$0xff]  ;;  %v128_v30 = vld [vmem:[%s525_s2 + $0x48] sm:$0xff] }
   0xb   :  { %v231_v31 = vld [vmem:[%s526_s3 + $0x40] sm:$0xff]  ;;  %v129_v32 = vld [vmem:[%s525_s2 + $0x50] sm:$0xff]  ;;  %v130_v33 = vld [vmem:[%s525_s2 + $0x58] sm:$0xff] }
   0xc   :  { %v34_v34 = vld [vmem:[%s524_s1 + $0x60] sm:$0xf]  ;;  %v232_v36 = vld [vmem:[%s526_s3 + $0x48] sm:$0xff]  ;;  %v234_v37 = vld [vmem:[%s526_s3 + $0x58] sm:$0xff] }
   0xd   :  { %v131_v35 = vld [vmem:[%s525_s2 + $0x60] sm:$0xf]  ;;  %v233_v38 = vld [vmem:[%s526_s3 + $0x50] sm:$0xff] }
   0xe   :  { %72 = vperm.xlu1 %345, %v29_v7   ;;  %67 = vperm.xlu0 %344, %v28_v8   ;;  %v235_v39 = vld [vmem:[%s526_s3 + $0x60] sm:$0xf] }
   0xf   :  { %v501_v62 = vld [vmem:[%s527_s0] ss:$0 sm:$0xff] }
  0x12   :  { %82 = vperm.xlu1 %345, %v31_v9   ;;  %77 = vperm.xlu0 %344, %v30_v10  }
  0x16   :  { %92 = vperm.xlu1 %345, %v33_v11   ;;  %87 = vperm.xlu0 %344, %v32_v12  }
  0x1a   :  { %139 = vperm.xlu1 %345, %v120_v13   ;;  %134 = vperm.xlu0 %344, %v119_v14  }
  0x1e   :  { %149 = vperm.xlu1 %345, %v122_v15   ;;  %144 = vperm.xlu0 %344, %v121_v16  }
  0x22   :  { %243 = vperm.xlu1 %345, %v224_v17   ;;  %238 = vperm.xlu0 %344, %v223_v18  }
  0x26   :  { %248 = vperm.xlu1 %345, %v225_v19   ;;  %154 = vperm.xlu0 %344, %v123_v20  }
  0x2a   :  { %253 = vperm.xlu1 %345, %v226_v21   ;;  %159 = vperm.xlu0 %344, %v124_v22  }
  0x2e   :  { %258 = vperm.xlu1 %345, %v227_v23   ;;  %164 = vperm.xlu0 %344, %v125_v24  }
  0x32   :  { %263 = vperm.xlu1 %345, %v228_v25   ;;  %169 = vperm.xlu0 %344, %v126_v26  }
  0x36   :  { %268 = vperm.xlu1 %345, %v229_v27   ;;  %174 = vperm.xlu0 %344, %v127_v28  }
  0x3a   :  { %273 = vperm.xlu1 %345, %v230_v29   ;;  %179 = vperm.xlu0 %344, %v128_v30  }
  0x3e   :  { %278 = vperm.xlu1 %345, %v231_v31   ;;  %184 = vperm.xlu0 %344, %v129_v32  }
  0x42   :  { %189 = vperm.xlu1 %345, %v130_v33   ;;  %97 = vperm.xlu0 %344, %v34_v34  }
  0x46   :  { %194 = vperm.xlu1 %345, %v131_v35   ;;  %283 = vperm.xlu0 %344, %v232_v36  }
  0x4a   :  { %293 = vperm.xlu1 %345, %v234_v37   ;;  %288 = vperm.xlu0 %344, %v233_v38  }
  0x4e   :  { %298 = vperm.xlu0 %344, %v235_v39  }
  0x81   :  { %v48_v40 = vpop.permute.xlu1 %47  ;;  %v38_v41 = vpop.permute.xlu0 %37 }
  0x82   :  { %v106_v1 = vmul.f32 %v501_v62, %v38_v41  ;;  %v108_v3 = vmul.f32 %v501_v62, %v48_v40 }
  0x85   :  { %v53_v42 = vpop.permute.xlu1 %52  ;;  %v43_v43 = vpop.permute.xlu0 %42 }
  0x86   :  { %v107_v2 = vmul.f32 %v501_v62, %v43_v43  ;;  %v109_v8 = vmul.f32 %v501_v62, %v53_v42 }
  0x89   :  { %v63_v44 = vpop.permute.xlu1 %62  ;;  %v58_v45 = vpop.permute.xlu0 %57 }
  0x8a   :  { %v110_v10 = vmul.f32 %v501_v62, %v58_v45  ;;  %v111_v14 = vmul.f32 %v501_v62, %v63_v44 }
  0x8d   :  { %v73_v46 = vpop.permute.xlu1 %72  ;;  %v68_v47 = vpop.permute.xlu0 %67 }
  0x8e   :  { %v112_v21 = vmul.f32 %v501_v62, %v68_v47  ;;  %v113_v25 = vmul.f32 %v501_v62, %v73_v46 }
  0x91   :  { %v83_v48 = vpop.permute.xlu1 %82  ;;  %v78_v49 = vpop.permute.xlu0 %77 }
  0x92   :  { %v114_v32 = vmul.f32 %v501_v62, %v78_v49  ;;  %v115_v37 = vmul.f32 %v501_v62, %v83_v48 }
  0x95   :  { %v494_v50 = vpop.permute.xlu1 %92  ;;  %v496_v51 = vpop.permute.xlu0 %87 }
  0x96   :  { %v116_v49 = vmul.f32 %v501_v62, %v496_v51  ;;  %v117_v48 = vmul.f32 %v501_v62, %v494_v50 }
  0x99   :  { %v140_v52 = vpop.permute.xlu1 %139  ;;  %v135_v53 = vpop.permute.xlu0 %134 }
  0x9a   :  { %v198_v4 = vadd.f32 %v140_v52, %v107_v2  ;;  %v197_v5 = vadd.f32 %v135_v53, %v106_v1 }
  0x9c   :  { %v211_v11 = vmax.f32 %v198_v4, 0.0  ;;  %v210_v12 = vmax.f32 %v197_v5, 0.0 }
  0x9d   :  { %v150_v54 = vpop.permute.xlu1 %149  ;;  %v145_v55 = vpop.permute.xlu0 %144 }
  0x9e   :  { %v199_v9 = vadd.f32 %v145_v55, %v108_v3  ;;  %v200_v13 = vadd.f32 %v150_v54, %v109_v8 }
  0xa0   :  { %v212_v17 = vmax.f32 %v199_v9, 0.0  ;;  %v213_v22 = vmax.f32 %v200_v13, 0.0 }
  0xa1   :  { %v244_v56 = vpop.permute.xlu1 %243  ;;  %v239_v57 = vpop.permute.xlu0 %238 }
  0xa2   :  { %v302_v18 = vmul.f32 %v244_v56, %v211_v11  ;;  %v301_v19 = vmul.f32 %v239_v57, %v210_v12 }
  0xa4   :  { %v314_v28 = vadd.f32 %v302_v18, %v301_v19 }
  0xa5   :  { %v249_v58 = vpop.permute.xlu1 %248  ;;  %v155_v59 = vpop.permute.xlu0 %154 }
  0xa6   :  { %v201_v20 = vadd.f32 %v155_v59, %v110_v10  ;;  %v303_v23 = vmul.f32 %v249_v58, %v212_v17 }
  0xa8   :  { %v214_v29 = vmax.f32 %v201_v20, 0.0  ;;  %v315_v33 = vadd.f32 %v314_v28, %v303_v23 }
  0xa9   :  { %v254_v60 = vpop.permute.xlu1 %253  ;;  %v160_v61 = vpop.permute.xlu0 %159 }
  0xaa   :  { %v202_v24 = vadd.f32 %v160_v61, %v111_v14  ;;  %v304_v30 = vmul.f32 %v254_v60, %v213_v22  ;;  %v335_v22 = vstv %s528_s4 }
  0xac   :  { %v215_v34 = vmax.f32 %v202_v24, 0.0  ;;  %v316_v40 = vadd.f32 %v315_v33, %v304_v30 }
  0xad   :  { %v259_v63 = vpop.permute.xlu1 %258  ;;  %v165_v0 = vpop.permute.xlu0 %164 }
  0xae   :  { %v203_v31 = vadd.f32 %v165_v0, %v112_v21  ;;  %v305_v35 = vmul.f32 %v259_v63, %v214_v29 }
  0xb0   :  { %v216_v41 = vmax.f32 %v203_v31, 0.0  ;;  %v317_v44 = vadd.f32 %v316_v40, %v305_v35 }
  0xb1   :  { %v264_v6 = vpop.permute.xlu1 %263  ;;  %v170_v7 = vpop.permute.xlu0 %169 }
  0xb2   :  { %v204_v36 = vadd.f32 %v170_v7, %v113_v25  ;;  %v306_v42 = vmul.f32 %v264_v6, %v215_v34 }
  0xb4   :  { %v217_v45 = vmax.f32 %v204_v36, 0.0  ;;  %v318_v54 = vadd.f32 %v317_v44, %v306_v42 }
  0xb5   :  { %v269_v15 = vpop.permute.xlu1 %268  ;;  %v175_v16 = vpop.permute.xlu0 %174 }
  0xb6   :  { %v205_v43 = vadd.f32 %v175_v16, %v114_v32  ;;  %v307_v46 = vmul.f32 %v269_v15, %v216_v41 }
  0xb8   :  { %v218_v55 = vmax.f32 %v205_v43, 0.0  ;;  %v319_v57 = vadd.f32 %v318_v54, %v307_v46 }
  0xb9   :  { %v274_v26 = vpop.permute.xlu1 %273  ;;  %v180_v27 = vpop.permute.xlu0 %179 }
  0xba   :  { %v206_v47 = vadd.f32 %v180_v27, %v115_v37  ;;  %v308_v56 = vmul.f32 %v274_v26, %v217_v45 }
  0xbc   :  { %v219_v58 = vmax.f32 %v206_v47, 0.0  ;;  %v320_v0 = vadd.f32 %v319_v57, %v308_v56 }
  0xbd   :  { %v279_v38 = vpop.permute.xlu1 %278  ;;  %v185_v39 = vpop.permute.xlu0 %184 }
  0xbe   :  { %v309_v59 = vmul.f32 %v279_v38, %v218_v55  ;;  %v207_v60 = vadd.f32 %v185_v39, %v116_v49 }
  0xc0   :  { %v321_v4 = vadd.f32 %v320_v0, %v309_v59  ;;  %v220_v5 = vmax.f32 %v207_v60, 0.0 }
  0xc1   :  { %v190_v52 = vpop.permute.xlu1 %189  ;;  %v98_v53 = vpop.permute.xlu0 %97 }
  0xc2   :  { %v208_v1 = vadd.f32 %v190_v52, %v117_v48  ;;  %v118_v2 = vmul.f32 %v501_v62, %v98_v53 }
  0xc4   :  { %v221_v8 = vmax.f32 %v208_v1, 0.0 }
  0xc5   :  { %v195_v61 = vpop.permute.xlu1 %194  ;;  %v284_v63 = vpop.permute.xlu0 %283 }
  0xc6   :  { %v310_v3 = vmul.f32 %v284_v63, %v219_v58  ;;  %v209_v51 = vadd.f32 %v195_v61, %v118_v2 }
  0xc8   :  { %v322_v9 = vadd.f32 %v321_v4, %v310_v3  ;;  %v222_v50 = vmax.f32 %v209_v51, 0.0 }
  0xc9   :  { %v294_v6 = vpop.permute.xlu1 %293  ;;  %v289_v7 = vpop.permute.xlu0 %288 }
  0xca   :  { %v311_v10 = vmul.f32 %v289_v7, %v220_v5  ;;  %v312_v11 = vmul.f32 %v294_v6, %v221_v8 }
  0xcc   :  { %v323_v12 = vadd.f32 %v322_v9, %v311_v10 }
  0xcd   :  { %v299_v13 = vpop.permute.xlu0 %298 }
  0xce   :  { %v324_v14 = vadd.f32 %v323_v12, %v312_v11  ;;  %v313_v15 = vmul.f32 %v299_v13, %v222_v50 }
  0xd0   :  { %v326_v16 = vsel %vm325_vm0, %v313_v15, 0.0 }
  0xd1   :  { %v327_v17 = vadd.f32 %v326_v16, %v324_v14 }
  0xd3   :  { %v328_v18 = vrot.slane %v327_v17, 4 }
  0xd5   :  { %v329_v62 = vadd.f32 %v328_v18, %v327_v17 }
  0xd7   :  { %v330_v19 = vrot.slane %v329_v62, 2 }
  0xd9   :  { %v331_v20 = vadd.f32 %v330_v19, %v329_v62 }
  0xdb   :  { %v332_v21 = vrot.slane %v331_v20, 1 }
  0xdd   :  { %v333_v23 = vadd.f32 %v332_v21, %v331_v20 }
  0xdf   :  { %v336_v24 = vadd.f32 %v335_v22, %v333_v23 }
  0xe1   :  { %337 = vst [vmem:[%s529_s5] sm:$0x1] %v336_v24 }

</bundles_post_ra>
